<compile_context>
chip_gen: v6e
topology: v6e:2x2x1
jax: 0.10.0
libtpu: 0.0.40
codegen_flags: <defaults>
</compile_context>

<pallas_src>
import functools

import jax
import jax.numpy as jnp
from jax.experimental import pallas as pl
from jax.experimental.pallas import tpu as pltpu

LANES = 128
SUBLANES = 8
ACC_ROWS = 64                         # 8 independent (8,128) vreg accumulators
NUM_SLICES = 2                        # leading "parallel" grid axis (both v7x TCs)
BLOCK_BYTE_BUDGET = 4 * 1024 * 1024   # per-input per-block VMEM budget
VMEM_LIMIT_BYTES = 32 * 1024 * 1024   # safe on v5e/v6e/v7x


def _binarize(x, thresh):
    """preds > thresh, matching torch semantics for float / integer inputs."""
    if thresh == 0.0 or jnp.issubdtype(x.dtype, jnp.floating):
        return x > jnp.asarray(thresh, x.dtype)
    # Integer/bool preds with a 0.5 threshold: compare in f32 (cheap VALU cast).
    return x.astype(jnp.float32) > jnp.float32(thresh)


def _binary_accuracy_count_kernel(pred_ref, tgt_ref, out_ref, acc_ref, *,
                                  thresh, tile_rows, acc_rows,
                                  rows_in_last, last_partial):
    i = pl.program_id(1)
    nsteps = pl.num_programs(1)

    @pl.when(i == 0)
    def _():
        acc_ref[...] = jnp.zeros_like(acc_ref)

    preds = pred_ref[...]
    tgts = tgt_ref[...]

    # Compare in native dtype (no upcast -> fewer HBM bytes / VALU ops).
    pred_b = _binarize(preds, thresh)
    tgt_b = tgts != jnp.asarray(0, tgts.dtype)
    match = pred_b == tgt_b                       # bool (tile_rows, 128)

    groups = tile_rows // acc_rows

    def fold(m):
        # (tile_rows,128) -> (acc_rows,128): sublane-group VALU adds into
        # `acc_rows/8` independent vreg accumulators (short dependence chain).
        # Bool is summed directly as int32 (no separate astype).
        return jnp.sum(m.reshape(groups, acc_rows, LANES), axis=0,
                       dtype=jnp.int32)

    if last_partial:
        @pl.when(i < nsteps - 1)
        def _():
            acc_ref[...] += fold(match)

        @pl.when(i == nsteps - 1)
        def _():
            # Mask the Pallas-supplied overhang rows of the final partial
            # block.  Rows inside the aligned bulk are always full 128-lane
            # rows, so a row mask is sufficient (no element mask needed).
            rows = jax.lax.broadcasted_iota(jnp.int32, match.shape, 0)
            acc_ref[...] += fold(jnp.logical_and(match, rows < rows_in_last))
    else:
        acc_ref[...] += fold(match)

    @pl.when(i == nsteps - 1)
    def _():
        # Per-cell int32 counts are far from overflow; export as f32 so the
        # wrapper-side scalar total cannot overflow int32 at huge N.
        out_ref[...] = acc_ref[...].astype(jnp.float32)


def binary_accuracy(preds, targets, *, as_logits=True, as_percentage=True,
                    block_byte_budget=BLOCK_BYTE_BUDGET):
    """Pallas implementation of BinaryAccuracy.forward (returns scalar f32)."""
    assert preds.shape == targets.shape
    n = int(preds.size)
    thresh = 0.0 if as_logits else 0.5

    pf = preds.reshape(-1)
    tf = targets.reshape(-1)

    align = NUM_SLICES * SUBLANES * LANES          # 2048 elements
    n_bulk = (n // align) * align
    n_tail = n - n_bulk

    # Tail (< 2048 elements): plain jnp; avoids padding/copying the full inputs.
    if n_tail:
        tail_match = (_binarize(pf[n_bulk:], thresh)
                      == (tf[n_bulk:] != jnp.asarray(0, tf.dtype)))
        tail_count = jnp.sum(tail_match, dtype=jnp.float32)
    else:
        tail_count = jnp.float32(0.0)

    if n_bulk:
        rows = n_bulk // LANES
        rows_per_slice = rows // NUM_SLICES        # multiple of 8 by construction

        itemsize = max(preds.dtype.itemsize, targets.dtype.itemsize)
        tile_rows = block_byte_budget // (LANES * itemsize)
        tile_rows = max(SUBLANES, (tile_rows // SUBLANES) * SUBLANES)
        tile_rows = min(tile_rows, rows_per_slice)
        acc_rows = ACC_ROWS if tile_rows % ACC_ROWS == 0 else SUBLANES

        steps = pl.cdiv(rows_per_slice, tile_rows)
        rows_in_last = rows_per_slice - (steps - 1) * tile_rows
        last_partial = rows_in_last != tile_rows

        p3 = pf[:n_bulk].reshape(NUM_SLICES, rows_per_slice, LANES)
        t3 = tf[:n_bulk].reshape(NUM_SLICES, rows_per_slice, LANES)

        kernel = functools.partial(
            _binary_accuracy_count_kernel,
            thresh=thresh, tile_rows=tile_rows, acc_rows=acc_rows,
            rows_in_last=rows_in_last, last_partial=last_partial)

        counts = pl.pallas_call(
            kernel,
            out_shape=jax.ShapeDtypeStruct((NUM_SLICES, acc_rows, LANES),
                                           jnp.float32),
            grid_spec=pltpu.PrefetchScalarGridSpec(
                num_scalar_prefetch=0,
                grid=(NUM_SLICES, steps),
                in_specs=[
                    pl.BlockSpec((None, tile_rows, LANES),
                                 lambda c, i: (c, i, 0)),
                    pl.BlockSpec((None, tile_rows, LANES),
                                 lambda c, i: (c, i, 0)),
                ],
                out_specs=pl.BlockSpec((None, acc_rows, LANES),
                                       lambda c, i: (c, 0, 0)),
                scratch_shapes=[pltpu.VMEM((acc_rows, LANES), jnp.int32)],
            ),
            compiler_params=pltpu.CompilerParams(
                dimension_semantics=("parallel", "arbitrary"),
                vmem_limit_bytes=VMEM_LIMIT_BYTES,
            ),
            cost_estimate=pl.CostEstimate(
                flops=4 * n_bulk,
                transcendentals=0,
                bytes_accessed=(n_bulk * (preds.dtype.itemsize
                                          + targets.dtype.itemsize)
                                + NUM_SLICES * acc_rows * LANES * 4),
            ),
        )(p3, t3)
        bulk_count = jnp.sum(counts)
    else:
        bulk_count = jnp.float32(0.0)

    acc = (bulk_count + tail_count) / jnp.float32(max(n, 1))
    if as_percentage:
        acc = acc * jnp.float32(100.0)
    return acc


def binary_accuracy_ref(preds, targets, *, as_logits=True, as_percentage=True):
    """Pure-JAX reference mirroring the PyTorch forward."""
    pb = preds > 0 if as_logits else preds > 0.5
    tb = targets != 0
    acc = jnp.sum(pb == tb).astype(jnp.float32) / max(int(preds.size), 1)
    if as_percentage:
        acc = acc * 100.0
    return acc


if __name__ == "__main__":
    key = jax.random.PRNGKey(0)
    k1, k2, k3, k4 = jax.random.split(key, 4)

    # Test 1: logits preds, binary float targets, NCHW-like shape (2,4,16,16)
    # = 2048 elements -> exactly one aligned slab split across the 2 slices.
    preds = jax.random.normal(k1, (2, 4, 16, 16), dtype=jnp.float32)
    targets = (jax.random.uniform(k2, (2, 4, 16, 16)) > 0.5).astype(jnp.float32)
    acc = jax.block_until_ready(
        binary_accuracy(preds, targets, as_logits=True, as_percentage=True))
    ref = binary_accuracy_ref(preds, targets, as_logits=True,
                              as_percentage=True)
    assert jnp.allclose(acc, ref, atol=1e-5), (acc, ref)

    # Test 2: odd size, probability-space preds, tiny block budget ->
    # multi-step grid with a masked partial last tile + jnp tail path.
    preds2 = jax.random.uniform(k3, (3, 5, 700), dtype=jnp.float32)
    targets2 = (jax.random.uniform(k4, (3, 5, 700)) > 0.5).astype(jnp.float32)
    acc2 = jax.block_until_ready(
        binary_accuracy(preds2, targets2, as_logits=False, as_percentage=False,
                        block_byte_budget=16 * LANES * 4))
    ref2 = binary_accuracy_ref(preds2, targets2, as_logits=False,
                               as_percentage=False)
    assert jnp.allclose(acc2, ref2, atol=1e-5), (acc2, ref2)

    # TODO(synk): storage_dict key plumbing (pred_key/tgt_key/out_key) is
    # host-side Python and intentionally not part of the kernel.
    print("KERNEL_OK")
</pallas_src>

<mosaic_0001>
module attributes {stable_mosaic.version = 11 : i64} {
  func.func @_binary_accuracy_count_kernel(%arg0: i32, %arg1: i32, %arg2: memref<1x8x128xf32, #tpu.memory_space<vmem>>, %arg3: memref<1x8x128xf32, #tpu.memory_space<vmem>>, %arg4: memref<1x8x128xf32, #tpu.memory_space<vmem>>, %arg5: memref<8x128xi32, #tpu.memory_space<vmem>>) attributes {dimension_semantics = [#tpu.dimension_semantics<parallel>, #tpu.dimension_semantics<arbitrary>], iteration_bounds = array<i64: 2, 1>, scalar_prefetch = 0 : i64, scratch_operands = 1 : i64, tpu.core_type = #tpu.core_type<tc>, window_params = [{transform_indices = @transform_0, window_bounds = array<i64: 1, 8, 128>}, {transform_indices = @transform_1, window_bounds = array<i64: 1, 8, 128>}, {transform_indices = @transform_2, window_bounds = array<i64: 1, 8, 128>}]} {
    %c0_i32 = arith.constant 0 : i32
    %0 = arith.cmpi eq, %arg1, %c0_i32 : i32
    %1 = arith.extui %0 : i1 to i32
    %c0_i32_0 = arith.constant 0 : i32
    %2 = arith.cmpi ne, %1, %c0_i32_0 : i32
    scf.if %2 {
      %c0_i32_15 = arith.constant 0 : i32
      %22 = vector.broadcast %c0_i32_15 : i32 to vector<8x128xi32>
      %c0_16 = arith.constant 0 : index
      %c0_17 = arith.constant 0 : index
      %23 = vector.load %arg5[%c0_16, %c0_17] : memref<8x128xi32, #tpu.memory_space<vmem>>, vector<8x128xi32>
      tpu.vector_store %arg5[%c0_16, %c0_17], %22 {strides = array<i32>} : memref<8x128xi32, #tpu.memory_space<vmem>>, vector<8x128xi32>,
    } else {
    }
    %c0 = arith.constant 0 : index
    %c0_1 = arith.constant 0 : index
    %c0_2 = arith.constant 0 : index
    %3 = vector.load %arg2[%c0, %c0_1, %c0_2] : memref<1x8x128xf32, #tpu.memory_space<vmem>>, vector<1x8x128xf32>
    %4 = vector.shape_cast %3 : vector<1x8x128xf32> to vector<8x128xf32>
    %c0_3 = arith.constant 0 : index
    %c0_4 = arith.constant 0 : index
    %c0_5 = arith.constant 0 : index
    %5 = vector.load %arg3[%c0_3, %c0_4, %c0_5] : memref<1x8x128xf32, #tpu.memory_space<vmem>>, vector<1x8x128xf32>
    %6 = vector.shape_cast %5 : vector<1x8x128xf32> to vector<8x128xf32>
    %cst = arith.constant 0.000000e+00 : f32
    %7 = vector.broadcast %cst : f32 to vector<8x128xf32>
    %8 = arith.cmpf ogt, %4, %7 : vector<8x128xf32>
    %cst_6 = arith.constant 0.000000e+00 : f32
    %9 = vector.broadcast %cst_6 : f32 to vector<8x128xf32>
    %10 = arith.cmpf one, %6, %9 : vector<8x128xf32>
    %11 = arith.xori %8, %10 : vector<8x128xi1>
    %cst_7 = arith.constant dense<true> : vector<8x128xi1>
    %12 = arith.xori %11, %cst_7 : vector<8x128xi1>
    %c0_8 = arith.constant 0 : index
    %c0_9 = arith.constant 0 : index
    %13 = vector.load %arg5[%c0_8, %c0_9] : memref<8x128xi32, #tpu.memory_space<vmem>>, vector<8x128xi32>
    %14 = vector.shape_cast %12 : vector<8x128xi1> to vector<1x8x128xi1>
    %15 = arith.extui %14 : vector<1x8x128xi1> to vector<1x8x128xi32>
    %cst_10 = arith.constant dense<0> : vector<8x128xi32>
    %16 = vector.multi_reduction <add>, %15, %cst_10 [0] : vector<1x8x128xi32> to vector<8x128xi32>
    %17 = arith.addi %13, %16 : vector<8x128xi32>
    %c0_11 = arith.constant 0 : index
    %c0_12 = arith.constant 0 : index
    %18 = vector.load %arg5[%c0_11, %c0_12] : memref<8x128xi32, #tpu.memory_space<vmem>>, vector<8x128xi32>
    tpu.vector_store %arg5[%c0_11, %c0_12], %17 {strides = array<i32>} : memref<8x128xi32, #tpu.memory_space<vmem>>, vector<8x128xi32>,
    %c0_i32_13 = arith.constant 0 : i32
    %19 = arith.cmpi eq, %arg1, %c0_i32_13 : i32
    %20 = arith.extui %19 : i1 to i32
    %c0_i32_14 = arith.constant 0 : i32
    %21 = arith.cmpi ne, %20, %c0_i32_14 : i32
    scf.if %21 {
      %c0_15 = arith.constant 0 : index
      %c0_16 = arith.constant 0 : index
      %22 = vector.load %arg5[%c0_15, %c0_16] : memref<8x128xi32, #tpu.memory_space<vmem>>, vector<8x128xi32>
      %23 = arith.sitofp %22 : vector<8x128xi32> to vector<8x128xf32>
      %c0_17 = arith.constant 0 : index
      %c0_18 = arith.constant 0 : index
      %c0_19 = arith.constant 0 : index
      %24 = vector.load %arg4[%c0_17, %c0_18, %c0_19] : memref<1x8x128xf32, #tpu.memory_space<vmem>>, vector<1x8x128xf32>
      %25 = vector.shape_cast %24 : vector<1x8x128xf32> to vector<8x128xf32>
      %26 = vector.shape_cast %23 : vector<8x128xf32> to vector<1x8x128xf32>
      tpu.vector_store %arg4[%c0_17, %c0_18, %c0_19], %26 {strides = array<i32>} : memref<1x8x128xf32, #tpu.memory_space<vmem>>, vector<1x8x128xf32>,
    } else {
    }
    return
  }
  func.func @transform_0(%arg0: i32, %arg1: i32) -> (i32, i32, i32) {
    %c0_i32 = arith.constant 0 : i32
    %c0_i32_0 = arith.constant 0 : i32
    return %arg0, %arg1, %c0_i32 : i32, i32, i32
  }
  func.func @transform_1(%arg0: i32, %arg1: i32) -> (i32, i32, i32) {
    %c0_i32 = arith.constant 0 : i32
    %c0_i32_0 = arith.constant 0 : i32
    return %arg0, %arg1, %c0_i32 : i32, i32, i32
  }
  func.func @transform_2(%arg0: i32, %arg1: i32) -> (i32, i32, i32) {
    %c0_i32 = arith.constant 0 : i32
    %c0_i32_0 = arith.constant 0 : i32
    %c0_i32_1 = arith.constant 0 : i32
    return %arg0, %c0_i32, %c0_i32_0 : i32, i32, i32
  }
}

</mosaic_0001>

<bundles_post_ra>
// kernel: tpu_custom_call.1
= control target key start
LH: loop header
LB: loop body
LE: loop exit
PB: predicated region body
PF: predicated region fallthrough
CT: control target
= control target key end

     0   :  { %7 = vsyncpa [#allocation4], 0  ;;  %s773_s0 = inlined_call_operand.hbm [shape: f32[2,8,128], index: 0, kind: input, shape index: {}]   ;;  %s774_s1 = inlined_call_operand.hbm [shape: f32[2,8,128], index: 1, kind: input, shape index: {}]   ;;  %s775_s2 = inlined_call_operand.hbm [shape: f32[2,8,128], index: 2, kind: output, shape index: {}]  }
   0x1   :  { %9 = vsyncpa [#allocation4 + $0x1], 0 }
   0x2   :  { %10 = vsyncpa [#allocation7], 0 }
   0x3   :  { %12 = vsyncpa [#allocation7 + $0x1], 0 }
   0x4   :  { %13 = vsyncpa [#allocation5], 0 }
   0x5   :  { %15 = vsyncpa [#allocation5 + $0x1], 0  ;;  %s600_s9 = smov 0   ;;  %s602_s10 = smov 0  }
   0x6   :  { %s604_s11 = smov 0   ;;  %s606_s12 = smov 0  }
   0x7   :  { %s608_s13 = smov 0   ;;  %s610_s14 = smov 0  }
   0x8 LB: > { %s352_s15 = sadd.s32 4294967295, %s578_s14   ;;  %s353_s16 = sadd.s32 4294967294, %s578_s14   ;;  %s578_s14 = sphi %s610_s14, %s21_s14   ;;  %s574_s13 = sphi %s608_s13, %s787_s13   ;;  %s570_s12 = sphi %s606_s12, %s786_s12   ;;  %s566_s11 = sphi %s604_s11, %s785_s11   ;;  %s562_s10 = sphi %s602_s10, %s784_s10   ;;  %s558_s9 = sphi %s600_s9, %s783_s9  }
   0x9   : > { %s33_s17 = sadd.s32 1, %s574_s13  ;;  %s42_s18 = sadd.s32 1, %s566_s11 }
   0xa   : > { %p35_p0 = scmp.ge.s32.totalorder %s33_s17, 2  ;;  %p49_p1 = scmp.ne.s32.totalorder %s566_s11, %s562_s10 }
   0xb   : > { %p50_p2 = scmp.eq.s32.totalorder %s578_s14, 0  ;;  %p55_p3 = scmp.ne.s32.totalorder %s562_s10, %s558_s9 }
   0xc   : > { %s789_s17 = smov (%p35_p0, %s33_s17), 0  ;;  %p56_p5 = scmp.eq.s32.totalorder %s352_s15, 0 }
   0xd   : > { %p641_p4 = por %p50_p2, %p49_p1  ;;  %s37_s20 = ssub.s32 %s574_s13, %s789_s17 }
   0xe   : > { %p107_p6 = scmp.eq.s32.totalorder %s352_s15, 1  ;;  %p40_p7 = scmp.eq.s32.totalorder %s37_s20, 0 }
   0xf   : > { %p647_p8 = por %p56_p5, %p55_p3  ;;  %p113_p10 = scmp.eq.s32.totalorder %s353_s16, 1 }
  0x10   : > { %p651_p9 = por %p107_p6, %p49_p1  ;;  %p386_p13 = scmp.lt.s32.totalorder %s578_s14, 2 }
  0x11   : > { %s656_s23 = scalar_select %p40_p7, %s566_s11, %s42_s18  }
  0x12   : > { %p658_p11 = por %p113_p10, %p55_p3  ;;  %s665_s25 = sand.u32 1, %s566_s11  }
  0x13   : > { %s356_s26 = sshll.u32 %s665_s25, 3  ;;  %s357_s27 = sshll.u32 %s574_s13, 7 }
  0x14   : > { %s143_s30 = scalar_lea.hbm %s773_s0, %s357_s27  ;;  %s137_s3 = scalar_lea.vmem [#allocation3], %s356_s26 }
  0x15   : > { %s145_s4 = sshll.u32 %s137_s3, 4  ;;  %p674_p0 = pnand %p386_p13, %p641_p4  ;;  %s146_s4 = int_to_ptr.vmem [resolvable:$true] %s145_s4 }
  0x16   : > { %p360_p1 = scmp.ge.s32.totalorder %s578_s14, 1  ;;  %p169_p2 = scmp.lt.s32.totalorder %s578_s14, 3 }
  0x17   : > { %s134_s6 = scalar_lea.sflag [#allocation4], %s665_s25  ;;  %p440_p3 = pneg %p674_p0 }
  0x18   : > { %s451_s7 = scalar_lea.vmem %s146_s4, 128  ;;  %s580_s8 = smov [#allocation3]  }
  0x19   : > { %p452_p5 = scmp.ne.s32.totalorder %s146_s4, %s451_s7  ;;  %s456_s15 = sshll.u32 %s580_s8, 4  ;;  %s457_s15 = int_to_ptr.vmem [resolvable:$false] %s456_s15 }
  0x1a   : > { %s458_s16 = scalar_lea.vmem %s457_s15, 256  ;;  %p459_p4 = scmp.lt.s32.totalorder %s146_s4, %s457_s15 }
  0x1b   : > { %p454_p6 = pnand %p452_p5, %p440_p3  ;;  %p460_p10 = scmp.lt.s32.totalorder %s458_s16, %s451_s7 }
  0x1d   : > { %p455_p7 = pneg %p454_p6  ;;  %p461_p13 = por %p460_p10, %p459_p4 }
  0x1f   : > { %p462_p12 = pnand %p461_p13, %p455_p7 }
  0x21   : > { %465 = shalt.err (!%p462_p12)
}
  0x22   : > { %378 = dma.hbm_to_vmem [thread:$0]  (!%p674_p0), %s143_s30, 128, %s146_s4, %s134_s6  }
  0x23   : > { %p692_p5 = pnand %p360_p1, %p169_p2  ;;  %s162_s28 = scalar_lea.hbm %s774_s1, %s357_s27 }
  0x24   : > { %s156_s29 = scalar_lea.vmem [#allocation6], %s356_s26  ;;  %s153_s7 = scalar_lea.sflag [#allocation7], %s665_s25 }
  0x25   : > { %s164_s3 = sshll.u32 %s156_s29, 4  ;;  %s581_s30 = smov [#allocation6]   ;;  %s165_s3 = int_to_ptr.vmem [resolvable:$true] %s164_s3 }
  0x26   : > { %s479_s8 = scalar_lea.vmem %s165_s3, 128  ;;  %s484_s4 = sshll.u32 %s581_s30, 4  ;;  %s485_s4 = int_to_ptr.vmem [resolvable:$false] %s484_s4 }
  0x27   : > { %p480_p12 = scmp.ne.s32.totalorder %s165_s3, %s479_s8  ;;  %s486_s6 = scalar_lea.vmem %s485_s4, 256 }
  0x28   : > { %p487_p1 = scmp.lt.s32.totalorder %s165_s3, %s485_s4  ;;  %p488_p2 = scmp.lt.s32.totalorder %s486_s6, %s479_s8 }
  0x29   : > { %p482_p6 = pnand %p480_p12, %p440_p3 }
  0x2a   : > { %p489_p4 = por %p488_p2, %p487_p1 }
  0x2b   : > { %p483_p7 = pneg %p482_p6 }
  0x2d   : > { %p490_p10 = pnand %p489_p4, %p483_p7 }
  0x2f   : > { %493 = shalt.err (!%p490_p10)
}
  0x30   : > { %381 = dma.hbm_to_vmem [thread:$0]  (!%p674_p0), %s162_s28, 128, %s165_s3, %s153_s7  }
  0x31   : > { %173 = sbr.rel (%p692_p5) target bundleno = 81 (0x51), region = 28  ;;  %s708_s25 = sand.u32 (!%p692_p5), 1, %s562_s10  }
  0x32   : > { %s361_s26 = sshll.u32 (!%p692_p5), %s708_s25, 3  ;;  %s176_s27 = scalar_lea.sflag (!%p692_p5), [#allocation4], %s708_s25 }
  0x33   : > { %s179_s15 = scalar_lea.vmem (!%p692_p5), [#allocation3], %s361_s26 }
  0x36   : > { %545 = dma.done.wait (%p647_p8), %s176_s27, 128  }
  0x37   : > { %547 = vsyncadd (%p647_p8), %s176_s27, 4294967168  ;;  %s185_s5 = scalar_lea.sflag [#allocation7], %s708_s25  ;;  %s188_s16 = scalar_lea.vmem [#allocation6], %s361_s26 }
  0x38   : > { %549 = dma.done.wait (%p647_p8), %s185_s5, 128  }
  0x39   : > { %551 = vsyncadd (%p647_p8), %s185_s5, 4294967168  ;;  %v219_v0 = vld [vmem:[%s179_s15] sm:$0xff]  ;;  %v220_v1 = vld [vmem:[%s188_s16] sm:$0xff]  ;;  %s213_s18 = scalar_lea.vmem [#allocation8], %s361_s26  ;;  %s365_s20 = sshll.u32 %s570_s12, 7  ;;  %vm582_vm3 = vmmov 1  }
  0x3a   : > { %s249_s19 = sshll.u32 %s213_s18, 4  ;;  %vm221_vm0 = vcmp.gt.f32.partialorder %v219_v0, 0.0  ;;  %vm222_vm1 = vcmp.ne.f32.partialorder %v220_v1, 0.0  ;;  %s727_s21 = scalar_lea.hbm %s775_s2, %s365_s20  ;;  %v583_v2 = vmov 0.0   ;;  %s722_s19 = int_to_ptr.vmem [resolvable:$true] %s249_s19 }
  0x3b   : > { %vm223_vm2 = vmxor %vm221_vm0, %vm222_vm1  ;;  %s236_s3 = scalar_lea.sflag [#allocation5], %s708_s25  ;;  %s494_s12 = scalar_lea.vmem %s722_s19, 128 }
  0x3c   : > { %vm224_vm4 = vmxor %vm223_vm2, %vm582_vm3  ;;  %p495_p8 = scmp.ne.s32.totalorder %s722_s19, %s494_s12  ;;  %s584_s7 = smov [#allocation8]  }
  0x3d   : > { %v368_v3 = vsel %vm224_vm4, 1.0, %v583_v2  ;;  %s498_s8 = sshll.u32 %s584_s7, 4  ;;  %s499_s8 = int_to_ptr.vmem [resolvable:$false] %s498_s8 }
  0x3e   : > { %234 = vst [vmem:[%s213_s18] sm:$0xff] %v368_v3  ;;  %p496_p0 = pnand %p495_p8, %p651_p9  ;;  %s500_s30 = scalar_lea.vmem %s499_s8, 256 }
  0x3f   : > { %p501_p13 = scmp.lt.s32.totalorder %s722_s19, %s499_s8  ;;  %p502_p5 = scmp.lt.s32.totalorder %s500_s30, %s494_s12 }
  0x40   : > { %p497_p3 = pneg %p496_p0 }
  0x41   : > { %p503_p12 = por %p502_p5, %p501_p13 }
  0x43   : > { %p504_p6 = pnand %p503_p12, %p497_p3 }
  0x45   : > { %507 = shalt.err (!%p504_p6)
}
  0x46   : > { %s508_s4 = scalar_lea.hbm %s727_s21, 128  ;;  %s512_s26 = scalar_lea.hbm %s775_s2, 256 }
  0x47   : > { %p509_p7 = scmp.ne.s32.totalorder %s727_s21, %s508_s4  ;;  %p513_p4 = scmp.lt.s32.totalorder %s727_s21, %s775_s2 }
  0x48   : > { %p514_p10 = scmp.lt.s32.totalorder %s512_s26, %s508_s4 }
  0x49   : > { %p510_p1 = pnand %p509_p7, %p651_p9 }
  0x4a   : > { %p515_p8 = por %p514_p10, %p513_p4 }
  0x4b   : > { %p511_p2 = pneg %p510_p1 }
  0x4d   : > { %p516_p0 = pnand %p515_p8, %p511_p2 }
  0x4f   : > { %519 = shalt.err (!%p516_p0)
}
  0x50   : > { %373 = dma.vmem_to_hbm [thread:$0]  (%p651_p9), %s722_s19, 128, %s727_s21, %s236_s3  }
  0x51 PF: > { %s261_s5 = sand.u32 1, %s558_s9   ;;  %p782_p3 = scmp.ge.s32.totalorder %s578_s14, 2 }
  0x52   : > { %s262_s16 = scalar_lea.sflag [#allocation5], %s261_s5 }
  0x53   : > { %p383_p13 = pnand %p782_p3, %p658_p11 }
  0x55   : > { %p384_p5 = pneg %p383_p13 }
  0x57   : > { %553 = dma.done.wait (%p384_p5), %s262_s16, 128  }
  0x58   : > { %555 = vsyncadd (%p384_p5), %s262_s16, 4294967168  ;;  %s21_s14 = sadd.s32 1, %s578_s14   ;;  %s783_s9 = smov %s562_s10 }
  0x59   : > { %p18_p12 = scmp.ge.s32.totalorder %s21_s14, 4   ;;  %s784_s10 = smov %s566_s11 }
  0x5a   : > { %s785_s11 = smov %s656_s23  ;;  %s786_s12 = smov %s574_s13 }
  0x5b   : > { %s787_s13 = smov %s789_s17  ;;  %20 = sbr.rel (!%p18_p12) target bundleno = 8 (0x8), region = 94 }
  0x60   :  { %267 = vsyncpa [#allocation4], 1 }
  0x61   :  { %269 = vsyncpa [#allocation4 + $0x1], 1 }
  0x62   :  { %270 = vsyncpa [#allocation7], 1 }
  0x63   :  { %272 = vsyncpa [#allocation7 + $0x1], 1 }
  0x64   :  { %273 = vsyncpa [#allocation5], 1 }
  0x65   :  { %275 = vsyncpa [#allocation5 + $0x1], 1 }

</bundles_post_ra>
